<compile_context>
chip_gen: v6e
topology: v6e:2x2x1
jax: 0.10.0
libtpu: 0.0.40
codegen_flags: <defaults>
</compile_context>

<pallas_src>
import functools

import jax
import jax.numpy as jnp
import numpy as np
from jax.experimental import pallas as pl
from jax.experimental.pallas import tpu as pltpu

NEG_SLOPE = 0.01          # F.leaky_relu default negative_slope
MASK_VAL = -1e30          # finite "-inf": avoids inf-inf NaN for isolated dst nodes
LANE = 128
SUBLANE = 8


def _round_up(x, m):
    return (x + m - 1) // m * m


# --------------------------------------------------------------------------- #
# Phase 1: projection kernel.  za = h @ [W^T | W^T a_src | W^T a_dst]
# --------------------------------------------------------------------------- #
def _project_kernel(h_ref, w_ref, z_ref, s_ref, *, out_pad):
    za = jnp.dot(h_ref[...], w_ref[...], preferred_element_type=jnp.float32)
    # out_pad is a multiple of 128 -> both slices are lane-tile aligned (views,
    # no relayout copy).
    z_ref[...] = za[:, :out_pad].astype(z_ref.dtype)     # bf16 z, streamed to phase 2
    s_ref[...] = za[:, out_pad:]                         # f32; col0 = s_src, col1 = s_dst


# --------------------------------------------------------------------------- #
# Phase 2: attention + aggregation with online softmax.
#   grid = (dst tiles [parallel], src tiles [arbitrary])
# --------------------------------------------------------------------------- #
def _gat_attn_kernel(s_dst_ref, s_src_ref, z_ref, adj_ref, *rest, use_residual):
    if use_residual:
        zdst_ref, out_ref, m_sc, l_sc, acc_sc = rest
    else:
        out_ref, m_sc, l_sc, acc_sc = rest

    j = pl.program_id(1)

    @pl.when(j == 0)
    def _():
        m_sc[...] = jnp.full_like(m_sc, MASK_VAL)
        l_sc[...] = jnp.zeros_like(l_sc)
        acc_sc[...] = jnp.zeros_like(acc_sc)

    # e[v,u] = leaky_relu(a_dst . z_dst[v] + a_src . z[u]), masked by block adjacency.
    e = s_dst_ref[...] + s_src_ref[...]                      # [tile_d, tile_s]
    e = jnp.where(e >= 0.0, e, NEG_SLOPE * e)
    e = jnp.where(adj_ref[...] > 0, e, MASK_VAL)             # exp(MASK_VAL - m) == 0

    m_prev = m_sc[...]
    m_new = jnp.maximum(m_prev, jnp.max(e, axis=-1, keepdims=True))
    rescale = jnp.exp(m_prev - m_new)
    p = jnp.exp(e - m_new)
    l_sc[...] = rescale * l_sc[...] + jnp.sum(p, axis=-1, keepdims=True)
    acc_sc[...] = rescale * acc_sc[...] + jnp.dot(
        p.astype(jnp.bfloat16), z_ref[...], preferred_element_type=jnp.float32)
    m_sc[...] = m_new

    @pl.when(j == pl.num_programs(1) - 1)
    def _():
        # Normalize after the matmul; isolated dst nodes (no incoming edge) -> zeros,
        # matching the reference's trailing where(adj, alpha, 0).
        has_edge = m_sc[...] > 0.5 * MASK_VAL
        denom = jnp.where(has_edge, l_sc[...], 1.0)
        result = acc_sc[...] * pl.reciprocal(denom, approx=True)
        result = jnp.where(has_edge, result, 0.0)
        if use_residual:
            result = result + zdst_ref[...].astype(jnp.float32)
        out_ref[...] = result.astype(out_ref.dtype)


# --------------------------------------------------------------------------- #
# Wrapper
# --------------------------------------------------------------------------- #
def gat_forward(h, w_fc, w_attn, dst_index, adj, *, use_residual=False,
                tile_d=128, tile_s=256):
    """Pallas GAT layer forward.

    h:         [N_src, in_dim]   f32 source-layer node features
    w_fc:      [out_dim, in_dim] f32 (torch Linear weight layout)
    w_attn:    [1, 2*out_dim]    f32 (torch Linear weight layout)
    dst_index: [N_dst]           int parent-nid of each dst node in the src layer
    adj:       [N_dst, N_src]    bool (edge u->v iff adj[v, u])
    """
    n_src, in_dim = h.shape
    out_dim = w_fc.shape[0]
    n_dst = dst_index.shape[0]

    out_pad = _round_up(out_dim, LANE)          # lane-dense z / output stores
    # Clamp tiles to the (aligned) problem so small graphs don't pay for padding.
    tile_s = min(tile_s, _round_up(n_src, LANE))      # src tile: lane axis of adj
    tile_d = min(tile_d, _round_up(n_dst, SUBLANE))   # dst tile: sublane axis
    n_src_p = _round_up(n_src, tile_s)
    n_dst_p = _round_up(n_dst, tile_d)
    n_src_tiles = n_src_p // tile_s
    n_dst_tiles = n_dst_p // tile_d

    # Fold attn_fc into the fc matmul: a_src . z[u] = h[u] . (W^T a_src), likewise a_dst.
    wt = jnp.asarray(w_fc, jnp.float32).T                    # [in_dim, out_dim]
    a_src = jnp.asarray(w_attn[0, :out_dim], jnp.float32)
    a_dst = jnp.asarray(w_attn[0, out_dim:], jnp.float32)
    w_aug = jnp.zeros((in_dim, out_pad + LANE), jnp.float32)
    w_aug = w_aug.at[:, :out_dim].set(wt)
    w_aug = w_aug.at[:, out_pad].set(wt @ a_src)
    w_aug = w_aug.at[:, out_pad + 1].set(wt @ a_dst)

    h_p = jnp.zeros((n_src_p, in_dim), jnp.float32).at[:n_src, :].set(h)

    # bf16 inputs, f32 accumulation (MXU-native; halves HBM/VMEM bytes).
    h_bf = h_p.astype(jnp.bfloat16)
    w_aug_bf = w_aug.astype(jnp.bfloat16)

    z_bf, s = pl.pallas_call(
        functools.partial(_project_kernel, out_pad=out_pad),
        out_shape=(jax.ShapeDtypeStruct((n_src_p, out_pad), jnp.bfloat16),
                   jax.ShapeDtypeStruct((n_src_p, LANE), jnp.float32)),
        grid=(n_src_tiles,),
        in_specs=[pl.BlockSpec((tile_s, in_dim), lambda i: (i, 0)),
                  pl.BlockSpec((in_dim, out_pad + LANE), lambda i: (0, 0))],
        out_specs=(pl.BlockSpec((tile_s, out_pad), lambda i: (i, 0)),
                   pl.BlockSpec((tile_s, LANE), lambda i: (i, 0))),
        compiler_params=pltpu.CompilerParams(
            dimension_semantics=("parallel",),
            vmem_limit_bytes=32 * 1024 * 1024),
    )(h_bf, w_aug_bf)

    # Cheap O(N_dst) index bookkeeping between the two kernels (replaces the dense
    # one-hot gather matrix and its [N_dst,N_src]x[N_src,out_dim] matmuls entirely).
    # TODO(synk): the torch.topk parent-nid matching is NodeFlow index bookkeeping;
    # dst_index is taken as given and applied with a plain gather here.
    dst_idx = jnp.asarray(dst_index, jnp.int32)
    s_src_row = s[:, 0].reshape(1, n_src_p)                               # [1, n_src_p]
    s_dst_col = jnp.zeros((n_dst_p, 1), jnp.float32).at[:n_dst, 0].set(s[dst_idx, 1])

    adj_p = jnp.zeros((n_dst_p, n_src_p), jnp.int8).at[:n_dst, :n_src].set(
        jnp.asarray(adj, jnp.int8))

    in_specs = [
        pl.BlockSpec((tile_d, 1), lambda i, j: (i, 0)),                   # s_dst column
        pl.BlockSpec((1, tile_s), lambda i, j: (0, j)),                   # s_src row
        pl.BlockSpec((tile_s, out_pad), lambda i, j: (j, 0)),             # z (bf16 stream)
        pl.BlockSpec((tile_d, tile_s), lambda i, j: (i, j)),              # adj (int8 stream)
    ]
    inputs = [s_dst_col, s_src_row, z_bf, adj_p]
    if use_residual:
        z_dst_p = jnp.zeros((n_dst_p, out_pad), jnp.bfloat16).at[:n_dst, :].set(
            z_bf[dst_idx])
        in_specs.append(pl.BlockSpec((tile_d, out_pad), lambda i, j: (i, 0)))
        inputs.append(z_dst_p)

    out = pl.pallas_call(
        functools.partial(_gat_attn_kernel, use_residual=use_residual),
        out_shape=jax.ShapeDtypeStruct((n_dst_p, out_pad), jnp.float32),
        grid_spec=pltpu.PrefetchScalarGridSpec(
            num_scalar_prefetch=0,
            grid=(n_dst_tiles, n_src_tiles),
            in_specs=in_specs,
            out_specs=pl.BlockSpec((tile_d, out_pad), lambda i, j: (i, 0)),
            scratch_shapes=[pltpu.VMEM((tile_d, 1), jnp.float32),          # running max m
                            pltpu.VMEM((tile_d, 1), jnp.float32),          # running denom l
                            pltpu.VMEM((tile_d, out_pad), jnp.float32)]),  # acc
        compiler_params=pltpu.CompilerParams(
            dimension_semantics=("parallel", "arbitrary"),
            vmem_limit_bytes=32 * 1024 * 1024),   # safe on v5e/v6e/v7x
    )(*inputs)

    return out[:n_dst, :out_dim]


# --------------------------------------------------------------------------- #
# Pure-JAX reference mirroring the PyTorch/DGL semantics.
# --------------------------------------------------------------------------- #
def gat_reference(h, w_fc, w_attn, dst_index, adj, *, use_residual=False):
    out_dim = w_fc.shape[0]
    z = h @ w_fc.T
    z_dst = z[dst_index]
    a_src = w_attn[0, :out_dim]
    a_dst = w_attn[0, out_dim:]
    E = (z_dst @ a_dst)[:, None] + (z @ a_src)[None, :]
    E = jnp.where(E >= 0.0, E, NEG_SLOPE * E)
    E = jnp.where(adj, E, -jnp.inf)
    alpha = jax.nn.softmax(E, axis=-1)
    alpha = jnp.where(adj, alpha, 0.0)
    out = alpha @ z
    if use_residual:
        out = out + z_dst
    return out


if __name__ == "__main__":
    # Small but multi-tile problem (exercises tiling, padding and the isolated-node guard).
    N_SRC, N_DST, IN_DIM, OUT_DIM = 500, 200, 64, 96

    key = jax.random.PRNGKey(0)
    k_fc, k_attn, k_h, k_adj, k_idx = jax.random.split(key, 5)

    # reset_parameters(): xavier_normal_ with gain = calculate_gain('relu') = sqrt(2)
    gain = float(np.sqrt(2.0))
    std_fc = gain * float(np.sqrt(2.0 / (IN_DIM + OUT_DIM)))
    w_fc = std_fc * jax.random.normal(k_fc, (OUT_DIM, IN_DIM), jnp.float32)
    std_attn = gain * float(np.sqrt(2.0 / (2 * OUT_DIM + 1)))
    w_attn = std_attn * jax.random.normal(k_attn, (1, 2 * OUT_DIM), jnp.float32)

    h = jax.random.normal(k_h, (N_SRC, IN_DIM), jnp.float32)

    dst_index = jax.random.randint(k_idx, (N_DST,), 0, N_SRC, dtype=jnp.int32)
    adj = jax.random.bernoulli(k_adj, 0.15, (N_DST, N_SRC))
    adj = adj.at[jnp.arange(N_DST), dst_index].set(True)   # self/parent edge
    adj = adj.at[7, :].set(False)                          # one isolated dst node

    for use_residual in (False, True):
        out = gat_forward(h, w_fc, w_attn, dst_index, adj, use_residual=use_residual)
        out = jax.block_until_ready(out)
        ref = gat_reference(h, w_fc, w_attn, dst_index, adj, use_residual=use_residual)
        # bf16 inputs / bf16 aggregation with f32 accumulation -> relaxed tolerance.
        np.testing.assert_allclose(np.asarray(out), np.asarray(ref),
                                   rtol=3e-2, atol=3e-2)

    print("KERNEL_OK")
</pallas_src>

<mosaic_0001>
module attributes {stable_mosaic.version = 11 : i64} {
  func.func @_project_kernel(%arg0: i32, %arg1: memref<256x64xbf16, #tpu.memory_space<vmem>>, %arg2: memref<64x256xbf16, #tpu.memory_space<vmem>>, %arg3: memref<256x128xbf16, #tpu.memory_space<vmem>>, %arg4: memref<256x128xf32, #tpu.memory_space<vmem>>) attributes {dimension_semantics = [#tpu.dimension_semantics<parallel>], iteration_bounds = array<i64: 2>, scalar_prefetch = 0 : i64, scratch_operands = 0 : i64, tpu.core_type = #tpu.core_type<tc>, window_params = [{transform_indices = @transform_0, window_bounds = array<i64: 256, 64>}, {pipeline_mode = #tpu.pipeline_mode<synchronous>, transform_indices = @transform_1, window_bounds = array<i64: 64, 256>}, {transform_indices = @transform_2, window_bounds = array<i64: 256, 128>}, {transform_indices = @transform_3, window_bounds = array<i64: 256, 128>}]} {
    %c0 = arith.constant 0 : index
    %c0_0 = arith.constant 0 : index
    %0 = vector.load %arg1[%c0, %c0_0] : memref<256x64xbf16, #tpu.memory_space<vmem>>, vector<256x64xbf16>
    %c0_1 = arith.constant 0 : index
    %c0_2 = arith.constant 0 : index
    %1 = vector.load %arg2[%c0_1, %c0_2] : memref<64x256xbf16, #tpu.memory_space<vmem>>, vector<64x256xbf16>
    %cst = arith.constant dense<0.000000e+00> : vector<256x256xf32>
    %2 = tpu.matmul %0, %1, %cst {dimension_numbers = #tpu.dot_dimension_numbers<[1], [0], [0], [1], [0, 0, 1, 1], [], []>} : vector<256x64xbf16>, vector<64x256xbf16>, vector<256x256xf32> -> vector<256x256xf32>
    %3 = vector.extract_strided_slice %2 {offsets = [0, 0], sizes = [256, 128], strides = [1, 1]} : vector<256x256xf32> to vector<256x128xf32>
    %4 = arith.truncf %3 : vector<256x128xf32> to vector<256x128xbf16>
    %c0_3 = arith.constant 0 : index
    %c0_4 = arith.constant 0 : index
    %5 = vector.load %arg3[%c0_3, %c0_4] : memref<256x128xbf16, #tpu.memory_space<vmem>>, vector<256x128xbf16>
    tpu.vector_store %arg3[%c0_3, %c0_4], %4 {strides = array<i32>} : memref<256x128xbf16, #tpu.memory_space<vmem>>, vector<256x128xbf16>,
    %6 = vector.extract_strided_slice %2 {offsets = [0, 128], sizes = [256, 128], strides = [1, 1]} : vector<256x256xf32> to vector<256x128xf32>
    %c0_5 = arith.constant 0 : index
    %c0_6 = arith.constant 0 : index
    %7 = vector.load %arg4[%c0_5, %c0_6] : memref<256x128xf32, #tpu.memory_space<vmem>>, vector<256x128xf32>
    tpu.vector_store %arg4[%c0_5, %c0_6], %6 {strides = array<i32>} : memref<256x128xf32, #tpu.memory_space<vmem>>, vector<256x128xf32>,
    return
  }
  func.func @transform_0(%arg0: i32) -> (i32, i32) {
    %c0_i32 = arith.constant 0 : i32
    %c0_i32_0 = arith.constant 0 : i32
    return %arg0, %c0_i32 : i32, i32
  }
  func.func @transform_1(%arg0: i32) -> (i32, i32) {
    %c0_i32 = arith.constant 0 : i32
    %c0_i32_0 = arith.constant 0 : i32
    %c0_i32_1 = arith.constant 0 : i32
    return %c0_i32, %c0_i32_0 : i32, i32
  }
  func.func @transform_2(%arg0: i32) -> (i32, i32) {
    %c0_i32 = arith.constant 0 : i32
    %c0_i32_0 = arith.constant 0 : i32
    return %arg0, %c0_i32 : i32, i32
  }
  func.func @transform_3(%arg0: i32) -> (i32, i32) {
    %c0_i32 = arith.constant 0 : i32
    %c0_i32_0 = arith.constant 0 : i32
    return %arg0, %c0_i32 : i32, i32
  }
}

</mosaic_0001>

<bundles_post_ra>
// kernel: tpu_custom_call.1
= control target key start
LH: loop header
LB: loop body
LE: loop exit
PB: predicated region body
PF: predicated region fallthrough
CT: control target
= control target key end

     0   :  { %9 = vsyncpa [#allocation3], 0  ;;  %s1593_s0 = inlined_call_operand.vmem [shape: bf16[512,64], index: 0, kind: input, shape index: {}]   ;;  %s1594_s1 = inlined_call_operand.vmem [shape: bf16[64,256], index: 1, kind: input, shape index: {}]   ;;  %s1595_s2 = inlined_call_operand.hbm [shape: bf16[512,128], index: 2, kind: output, shape index: {0}]   ;;  %s1596_s3 = inlined_call_operand.hbm [shape: f32[512,128], index: 3, kind: output, shape index: {1}]  }
   0x1   :  { %11 = vsyncpa [#allocation3 + $0x1], 0 }
   0x2   :  { %12 = vsyncpa [#allocation5], 0 }
   0x3   :  { %14 = vsyncpa [#allocation5 + $0x1], 0  ;;  %s1329_s12 = smov 0   ;;  %s1331_s13 = smov 0  }
   0x4   :  { %s1333_s14 = smov 0   ;;  %s1335_s15 = smov 0  }
   0x5 LB: > { %s1350_s16 = sadd.s32 4294967295, %s1300_s15   ;;  %s908_s17 = sadd.s32 4294967294, %s1300_s15   ;;  %s1300_s15 = sphi %s1335_s15, %s1602_s15   ;;  %s1296_s14 = sphi %s1333_s14, %s1601_s14   ;;  %s1292_s13 = sphi %s1331_s13, %s1600_s13   ;;  %s1288_s12 = sphi %s1329_s12, %s1599_s12  }
   0x6   : > { %s1354_s18 = sadd.s32 1, %s1300_s15   ;;  %s74_s19 = sadd.s32 1, %s1296_s14 }
   0x7   : > { %s71_s20 = ssub.s32 %s1300_s15, %s1354_s18  ;;  %p84_p0 = scmp.ne.s32.totalorder %s1296_s14, %s1292_s13 }
   0x8   : > { %p72_p1 = scmp.eq.s32.totalorder %s71_s20, 0  ;;  %p85_p2 = scmp.eq.s32.totalorder %s1350_s16, 1 }
   0x9   : > { %p90_p3 = scmp.ne.s32.totalorder %s1292_s13, %s1288_s12  ;;  %p91_p4 = scmp.eq.s32.totalorder %s908_s17, 1 }
   0xa   : > { %s1365_s21 = scalar_select %p72_p1, %s1296_s14, %s74_s19  }
   0xb   : > { %p1367_p5 = por %p85_p2, %p84_p0  ;;  %p1371_p6 = por %p91_p4, %p90_p3 }
   0xc   : > { %p911_p7 = scmp.ge.s32.totalorder %s1300_s15, 1  ;;  %p147_p8 = scmp.lt.s32.totalorder %s1300_s15, 3 }
   0xe   : > { %p148_p9 = pnand %p911_p7, %p147_p8 }
   0xf   : > { %s914_s26 = sshll.u32 (!%p148_p9), %s1350_s16, 5  ;;  %s1456_s27 = sand.u32 (!%p148_p9), 1, %s1292_s13  }
  0x10   : > { %151 = sbr.rel (%p148_p9) target bundleno = 332 (0x14c), region = 28  ;;  %p177_p10 = scmp.lt.s32.totalorder (!%p148_p9), %s914_s26, 63 }
  0x11   : > { %s913_s28 = sshll.u32 (!%p148_p9), %s1456_s27, 8  ;;  %s912_s29 = sshll.u32 (!%p148_p9), %s1456_s27, 7 }
  0x12   : > { %s1460_s30 = scalar_lea.vmem (!%p148_p9), [#allocation4], %s913_s28  ;;  %s1464_s4 = scalar_lea.vmem (!%p148_p9), [#allocation2], %s912_s29 }
  0x13   : > { %s1028_s5 = sshll.u32 (!%p148_p9), %s1350_s16, 11  ;;  %s798_s6 = sshll.u32 (!%p148_p9), %s1464_s4, 4  ;;  %s1517_s6 = int_to_ptr.vmem [resolvable:$true] %s798_s6 }
  0x14   : > { %s1029_s7 = sshll.u32 (!%p148_p9), %s1350_s16, 12  ;;  %s780_s20 = scalar_lea.sflag (!%p148_p9), [#allocation3], %s1456_s27 }
  0x15   : > { %v1182_v0 = vld [vmem:[%s1594_s1 + $0x34] ss:$8 sps:$4 sm:$0xff]   ;;  %v1184_v1 = vld [vmem:[%s1594_s1 + $0x30] ss:$8 sps:$4 sm:$0xff]   ;;  %v1302_v2 = vmov 0   ;;  %s1604_s26 = smov (!%p177_p10, %s914_s26), 63  ;;  %s1522_s19 = scalar_lea.hbm %s1596_s3, %s1029_s7 }
  0x16   : > { %426 = vmatprep.mubr.bf16.mxu0 %v1302_v2  ;;  %506 = vmatprep.mubr.bf16.mxu1 %v1302_v2  ;;  %v1185_v3 = vld [vmem:[%s1594_s1 + $0x24] ss:$8 sps:$4 sm:$0xff]   ;;  %v1187_v4 = vld [vmem:[%s1594_s1 + $0x20] ss:$8 sps:$4 sm:$0xff]   ;;  %v1188_v5 = vld [vmem:[%s1594_s1 + $0x14] ss:$8 sps:$4 sm:$0xff]  }
  0x17   : > { %402 = vmatprep.subr.bf16.mxu0 %v1182_v0  ;;  %1125 = vmatprep.subr.bf16.mxu1 %v1182_v0  ;;  %s915_s8 = sshll.u32 %s1604_s26, 2  ;;  %v1190_v6 = vld [vmem:[%s1594_s1 + $0x10] ss:$8 sps:$4 sm:$0xff]   ;;  %v1191_v7 = vld [vmem:[%s1594_s1 + $0x4] ss:$8 sps:$4 sm:$0xff]   ;;  %vm345_vm0 = vcmask 523264  }
  0x18   : > { %403 = vmatpush1.bf16.msra.mxu0 %v1184_v1  ;;  %1129 = vmatpush1.bf16.msra.mxu1 %v1184_v1  ;;  %s1398_s11 = scalar_lea.vmem %s1593_s0, %s915_s8  ;;  %v1193_v8 = vld [vmem:[%s1594_s1] ss:$8 sps:$4 sm:$0xff]   ;;  %s814_s8 = sshll.u32 %s1460_s30, 4  ;;  %s1524_s8 = int_to_ptr.vmem [resolvable:$true] %s814_s8 }
  0x19   : > { %404 = vmatprep.subr.bf16.mxu0 %v1185_v3  ;;  %1126 = vmatprep.subr.bf16.mxu1 %v1185_v3  ;;  %v1194_v9 = vld [vmem:[%s1398_s11] sm:$0xff]   ;;  %v1196_v11 = vld [vmem:[%s1398_s11 + $0x8] sm:$0xff]   ;;  %v1198_v13 = vld [vmem:[%s1398_s11 + $0x10] sm:$0xff]   ;;  %s1210_s24 = scalar_lea.vmem %s1517_s6, 2048  ;;  %s1303_s25 = smov [#allocation2]  }
  0x1a   : > { %v1195_v10 = vld [vmem:[%s1398_s11 + $0x40] sm:$0xff]   ;;  %v1197_v12 = vld [vmem:[%s1398_s11 + $0x48] sm:$0xff]   ;;  %v1199_v14 = vld [vmem:[%s1398_s11 + $0x50] sm:$0xff]   ;;  %p1211_p11 = scmp.ne.s32.totalorder %s1517_s6, %s1210_s24  ;;  %s1214_s26 = sshll.u32 %s1303_s25, 4  ;;  %s1215_s26 = int_to_ptr.vmem [resolvable:$false] %s1214_s26 }
  0x1b   : > { %v1200_v15 = vld [vmem:[%s1398_s11 + $0x18] sm:$0xff]   ;;  %v1202_v17 = vld [vmem:[%s1398_s11 + $0x20] sm:$0xff]   ;;  %v1204_v19 = vld [vmem:[%s1398_s11 + $0x28] sm:$0xff]   ;;  %s1216_s28 = scalar_lea.vmem %s1215_s26, 4096  ;;  %p1217_p0 = scmp.lt.s32.totalorder %s1517_s6, %s1215_s26 }
  0x1c   : > { %405 = vmatpush1.bf16.msra.mxu0 %v1187_v4  ;;  %1130 = vmatpush1.bf16.msra.mxu1 %v1187_v4  ;;  %v1201_v16 = vld [vmem:[%s1398_s11 + $0x58] sm:$0xff]   ;;  %v1203_v18 = vld [vmem:[%s1398_s11 + $0x60] sm:$0xff]   ;;  %v1205_v20 = vld [vmem:[%s1398_s11 + $0x68] sm:$0xff]   ;;  %p1212_p12 = pnand %p1211_p11, %p1367_p5  ;;  %p1218_p1 = scmp.lt.s32.totalorder %s1216_s28, %s1210_s24 }
  0x1d   : > { %406 = vmatprep.subr.bf16.mxu0 %v1188_v5  ;;  %1127 = vmatprep.subr.bf16.mxu1 %v1188_v5  ;;  %v1206_v21 = vld [vmem:[%s1398_s11 + $0x30] sm:$0xff]   ;;  %v1208_v23 = vld [vmem:[%s1398_s11 + $0x38] sm:$0xff]  }
  0x1e   : > { %v1207_v22 = vld [vmem:[%s1398_s11 + $0x70] sm:$0xff]   ;;  %v1209_v24 = vld [vmem:[%s1398_s11 + $0x78] sm:$0xff]   ;;  %s1515_s11 = scalar_lea.hbm %s1595_s2, %s1028_s5  ;;  %p1213_p13 = pneg %p1212_p12 }
  0x1f   : > { %p1219_p2 = por %p1218_p1, %p1217_p0 }
  0x20   : > { %407 = vmatpush1.bf16.msra.mxu0 %v1190_v6  ;;  %1131 = vmatpush1.bf16.msra.mxu1 %v1190_v6 }
  0x21   : > { %408 = vmatprep.subr.bf16.mxu0 %v1191_v7  ;;  %1128 = vmatprep.subr.bf16.mxu1 %v1191_v7  ;;  %p1220_p3 = pnand %p1219_p2, %p1213_p13 }
  0x24   : > { %409 = vmatpush1.bf16.msra.mxu0 %v1193_v8  ;;  %1132 = vmatpush1.bf16.msra.mxu1 %v1193_v8 }
  0x27   : > { %940 = vmatmul.mubr.msk.bf16.vlgmr.msra.gmra.mxu0 %vm345_vm0, %v1194_v9  ;;  %948 = vmatmul.mubr.msk.bf16.vlgmr.msra.gmra.mxu1 %vm345_vm0, %v1195_v10 }
  0x28   : > { %436 = vmatprep.mubr.bf16.mxu0 %v1302_v2  ;;  %516 = vmatprep.mubr.bf16.mxu1 %v1302_v2 }
  0x2f   : > { %941 = vmatmul.mubr.msk.bf16.gmra.mxu0 %vm345_vm0, %v1196_v11  ;;  %949 = vmatmul.mubr.msk.bf16.gmra.mxu1 %vm345_vm0, %v1197_v12 }
  0x30   : > { %446 = vmatprep.mubr.bf16.mxu0 %v1302_v2  ;;  %526 = vmatprep.mubr.bf16.mxu1 %v1302_v2 }
  0x37   : > { %942 = vmatmul.mubr.msk.bf16.gmra.mxu0 %vm345_vm0, %v1198_v13  ;;  %950 = vmatmul.mubr.msk.bf16.gmra.mxu1 %vm345_vm0, %v1199_v14 }
  0x38   : > { %456 = vmatprep.mubr.bf16.mxu0 %v1302_v2  ;;  %536 = vmatprep.mubr.bf16.mxu1 %v1302_v2 }
  0x3f   : > { %943 = vmatmul.mubr.msk.bf16.gmra.mxu0 %vm345_vm0, %v1200_v15  ;;  %951 = vmatmul.mubr.msk.bf16.gmra.mxu1 %vm345_vm0, %v1201_v16 }
  0x40   : > { %466 = vmatprep.mubr.bf16.mxu0 %v1302_v2  ;;  %546 = vmatprep.mubr.bf16.mxu1 %v1302_v2 }
  0x47   : > { %944 = vmatmul.mubr.msk.bf16.gmra.mxu0 %vm345_vm0, %v1202_v17  ;;  %952 = vmatmul.mubr.msk.bf16.gmra.mxu1 %vm345_vm0, %v1203_v18 }
  0x48   : > { %476 = vmatprep.mubr.bf16.mxu0 %v1302_v2  ;;  %556 = vmatprep.mubr.bf16.mxu1 %v1302_v2 }
  0x4f   : > { %945 = vmatmul.mubr.msk.bf16.gmra.mxu0 %vm345_vm0, %v1204_v19  ;;  %953 = vmatmul.mubr.msk.bf16.gmra.mxu1 %vm345_vm0, %v1205_v20 }
  0x50   : > { %486 = vmatprep.mubr.bf16.mxu0 %v1302_v2  ;;  %566 = vmatprep.mubr.bf16.mxu1 %v1302_v2 }
  0x57   : > { %946 = vmatmul.mubr.msk.bf16.gmra.mxu0 %vm345_vm0, %v1206_v21  ;;  %954 = vmatmul.mubr.msk.bf16.gmra.mxu1 %vm345_vm0, %v1207_v22 }
  0x58   : > { %496 = vmatprep.mubr.bf16.mxu0 %v1302_v2  ;;  %576 = vmatprep.mubr.bf16.mxu1 %v1302_v2 }
  0x5f   : > { %947 = vmatmul.mubr.msk.bf16.gmra.mxu0 %vm345_vm0, %v1208_v23  ;;  %955 = vmatmul.mubr.msk.bf16.gmra.mxu1 %vm345_vm0, %v1209_v24 }
  0xe7   : > { %v428_v25 = vpop.f32.mrf.mxu0  ;;  %v508_v26 = vpop.f32.mrf.mxu1 }
  0xe9   : > { %v430_v27 = vpop.f32.mrf.mxu0  ;;  %v510_v28 = vpop.f32.mrf.mxu1 }
  0xea   : > { %747 = vst [vmem:[%s1460_s30] sm:$0xff] %v430_v27  ;;  %763 = vst [vmem:[%s1460_s30 + $0x80] sm:$0xff] %v510_v28 }
  0xeb   : > { %v432_v29 = vpop.f32.mrf.mxu0  ;;  %v512_v30 = vpop.f32.mrf.mxu1 }
  0xec   : > { %v1033_v31 = vpack.c.bf16 %v432_v29, %v428_v25  ;;  %v1073_v32 = vpack.c.bf16 %v512_v30, %v508_v26 }
  0xed   : > { %v434_v33 = vpop.f32.mrf.mxu0  ;;  %v514_v34 = vpop.f32.mrf.mxu1 }
  0xee   : > { %1034 = vst [vmem:[%s1464_s4] sm:$0xff] %v1033_v31   ;;  %1117 = vst [vmem:[%s1464_s4 + $0x40] sm:$0xff] %v1073_v32  }
  0xef   : > { %748 = vst [vmem:[%s1460_s30 + $0x8] sm:$0xff] %v434_v33  ;;  %764 = vst [vmem:[%s1460_s30 + $0x88] sm:$0xff] %v514_v34  ;;  %v438_v35 = vpop.f32.mrf.mxu0  ;;  %v518_v36 = vpop.f32.mrf.mxu1 }
  0xf1   : > { %v440_v37 = vpop.f32.mrf.mxu0  ;;  %v520_v38 = vpop.f32.mrf.mxu1 }
  0xf2   : > { %749 = vst [vmem:[%s1460_s30 + $0x10] sm:$0xff] %v440_v37  ;;  %765 = vst [vmem:[%s1460_s30 + $0x90] sm:$0xff] %v520_v38 }
  0xf3   : > { %v442_v39 = vpop.f32.mrf.mxu0  ;;  %v522_v40 = vpop.f32.mrf.mxu1 }
  0xf4   : > { %v1038_v41 = vpack.c.bf16 %v442_v39, %v438_v35  ;;  %v1078_v42 = vpack.c.bf16 %v522_v40, %v518_v36 }
  0xf5   : > { %v444_v43 = vpop.f32.mrf.mxu0  ;;  %v524_v44 = vpop.f32.mrf.mxu1 }
  0xf6   : > { %1110 = vst [vmem:[%s1464_s4 + $0x8] sm:$0xff] %v1038_v41   ;;  %1118 = vst [vmem:[%s1464_s4 + $0x48] sm:$0xff] %v1078_v42  }
  0xf7   : > { %750 = vst [vmem:[%s1460_s30 + $0x18] sm:$0xff] %v444_v43  ;;  %766 = vst [vmem:[%s1460_s30 + $0x98] sm:$0xff] %v524_v44  ;;  %v448_v45 = vpop.f32.mrf.mxu0  ;;  %v528_v46 = vpop.f32.mrf.mxu1 }
  0xf9   : > { %v450_v47 = vpop.f32.mrf.mxu0  ;;  %v530_v48 = vpop.f32.mrf.mxu1 }
  0xfa   : > { %751 = vst [vmem:[%s1460_s30 + $0x20] sm:$0xff] %v450_v47  ;;  %767 = vst [vmem:[%s1460_s30 + $0xa0] sm:$0xff] %v530_v48 }
  0xfb   : > { %v452_v49 = vpop.f32.mrf.mxu0  ;;  %v532_v50 = vpop.f32.mrf.mxu1 }
  0xfc   : > { %v1043_v51 = vpack.c.bf16 %v452_v49, %v448_v45  ;;  %v1083_v52 = vpack.c.bf16 %v532_v50, %v528_v46 }
  0xfd   : > { %v454_v53 = vpop.f32.mrf.mxu0  ;;  %v534_v54 = vpop.f32.mrf.mxu1 }
  0xfe   : > { %1111 = vst [vmem:[%s1464_s4 + $0x10] sm:$0xff] %v1043_v51   ;;  %1119 = vst [vmem:[%s1464_s4 + $0x50] sm:$0xff] %v1083_v52  }
  0xff   : > { %752 = vst [vmem:[%s1460_s30 + $0x28] sm:$0xff] %v454_v53  ;;  %768 = vst [vmem:[%s1460_s30 + $0xa8] sm:$0xff] %v534_v54  ;;  %v458_v55 = vpop.f32.mrf.mxu0  ;;  %v538_v56 = vpop.f32.mrf.mxu1 }
 0x101   : > { %v460_v57 = vpop.f32.mrf.mxu0  ;;  %v540_v58 = vpop.f32.mrf.mxu1 }
 0x102   : > { %753 = vst [vmem:[%s1460_s30 + $0x30] sm:$0xff] %v460_v57  ;;  %769 = vst [vmem:[%s1460_s30 + $0xb0] sm:$0xff] %v540_v58 }
 0x103   : > { %v462_v59 = vpop.f32.mrf.mxu0  ;;  %v542_v60 = vpop.f32.mrf.mxu1 }
 0x104   : > { %v1048_v61 = vpack.c.bf16 %v462_v59, %v458_v55  ;;  %v1088_v62 = vpack.c.bf16 %v542_v60, %v538_v56 }
 0x105   : > { %v464_v63 = vpop.f32.mrf.mxu0  ;;  %v544_v0 = vpop.f32.mrf.mxu1 }
 0x106   : > { %1112 = vst [vmem:[%s1464_s4 + $0x18] sm:$0xff] %v1048_v61   ;;  %1120 = vst [vmem:[%s1464_s4 + $0x58] sm:$0xff] %v1088_v62  }
 0x107   : > { %754 = vst [vmem:[%s1460_s30 + $0x38] sm:$0xff] %v464_v63  ;;  %770 = vst [vmem:[%s1460_s30 + $0xb8] sm:$0xff] %v544_v0  ;;  %v468_v1 = vpop.f32.mrf.mxu0  ;;  %v548_v2 = vpop.f32.mrf.mxu1 }
 0x109   : > { %v470_v3 = vpop.f32.mrf.mxu0  ;;  %v550_v4 = vpop.f32.mrf.mxu1 }
 0x10a   : > { %755 = vst [vmem:[%s1460_s30 + $0x40] sm:$0xff] %v470_v3  ;;  %771 = vst [vmem:[%s1460_s30 + $0xc0] sm:$0xff] %v550_v4 }
 0x10b   : > { %v472_v5 = vpop.f32.mrf.mxu0  ;;  %v552_v6 = vpop.f32.mrf.mxu1 }
 0x10c   : > { %v1053_v7 = vpack.c.bf16 %v472_v5, %v468_v1  ;;  %v1093_v8 = vpack.c.bf16 %v552_v6, %v548_v2 }
 0x10d   : > { %v474_v9 = vpop.f32.mrf.mxu0  ;;  %v554_v10 = vpop.f32.mrf.mxu1 }
 0x10e   : > { %1113 = vst [vmem:[%s1464_s4 + $0x20] sm:$0xff] %v1053_v7   ;;  %1121 = vst [vmem:[%s1464_s4 + $0x60] sm:$0xff] %v1093_v8  }
 0x10f   : > { %756 = vst [vmem:[%s1460_s30 + $0x48] sm:$0xff] %v474_v9  ;;  %772 = vst [vmem:[%s1460_s30 + $0xc8] sm:$0xff] %v554_v10  ;;  %v478_v11 = vpop.f32.mrf.mxu0  ;;  %v558_v12 = vpop.f32.mrf.mxu1 }
 0x111   : > { %v480_v13 = vpop.f32.mrf.mxu0  ;;  %v560_v14 = vpop.f32.mrf.mxu1 }
 0x112   : > { %757 = vst [vmem:[%s1460_s30 + $0x50] sm:$0xff] %v480_v13  ;;  %773 = vst [vmem:[%s1460_s30 + $0xd0] sm:$0xff] %v560_v14 }
 0x113   : > { %v482_v15 = vpop.f32.mrf.mxu0  ;;  %v562_v16 = vpop.f32.mrf.mxu1 }
 0x114   : > { %v1058_v17 = vpack.c.bf16 %v482_v15, %v478_v11  ;;  %v1098_v18 = vpack.c.bf16 %v562_v16, %v558_v12 }
 0x115   : > { %v484_v19 = vpop.f32.mrf.mxu0  ;;  %v564_v20 = vpop.f32.mrf.mxu1 }
 0x116   : > { %1114 = vst [vmem:[%s1464_s4 + $0x28] sm:$0xff] %v1058_v17   ;;  %1122 = vst [vmem:[%s1464_s4 + $0x68] sm:$0xff] %v1098_v18  }
 0x117   : > { %758 = vst [vmem:[%s1460_s30 + $0x58] sm:$0xff] %v484_v19  ;;  %774 = vst [vmem:[%s1460_s30 + $0xd8] sm:$0xff] %v564_v20  ;;  %v488_v21 = vpop.f32.mrf.mxu0  ;;  %v568_v22 = vpop.f32.mrf.mxu1 }
 0x119   : > { %v490_v23 = vpop.f32.mrf.mxu0  ;;  %v570_v24 = vpop.f32.mrf.mxu1 }
 0x11a   : > { %759 = vst [vmem:[%s1460_s30 + $0x60] sm:$0xff] %v490_v23  ;;  %775 = vst [vmem:[%s1460_s30 + $0xe0] sm:$0xff] %v570_v24 }
 0x11b   : > { %v492_v25 = vpop.f32.mrf.mxu0  ;;  %v572_v26 = vpop.f32.mrf.mxu1 }
 0x11c   : > { %v1063_v27 = vpack.c.bf16 %v492_v25, %v488_v21  ;;  %v1103_v28 = vpack.c.bf16 %v572_v26, %v568_v22 }
 0x11d   : > { %v494_v29 = vpop.f32.mrf.mxu0  ;;  %v574_v30 = vpop.f32.mrf.mxu1 }
 0x11e   : > { %1115 = vst [vmem:[%s1464_s4 + $0x30] sm:$0xff] %v1063_v27   ;;  %1123 = vst [vmem:[%s1464_s4 + $0x70] sm:$0xff] %v1103_v28  }
 0x11f   : > { %760 = vst [vmem:[%s1460_s30 + $0x68] sm:$0xff] %v494_v29  ;;  %776 = vst [vmem:[%s1460_s30 + $0xe8] sm:$0xff] %v574_v30  ;;  %v498_v31 = vpop.f32.mrf.mxu0  ;;  %v578_v32 = vpop.f32.mrf.mxu1 }
 0x121   : > { %v500_v33 = vpop.f32.mrf.mxu0  ;;  %v580_v34 = vpop.f32.mrf.mxu1 }
 0x122   : > { %761 = vst [vmem:[%s1460_s30 + $0x70] sm:$0xff] %v500_v33  ;;  %777 = vst [vmem:[%s1460_s30 + $0xf0] sm:$0xff] %v580_v34 }
 0x123   : > { %v502_v35 = vpop.f32.mrf.mxu0  ;;  %v582_v36 = vpop.f32.mrf.mxu1 }
 0x124   : > { %v1068_v37 = vpack.c.bf16 %v502_v35, %v498_v31  ;;  %v1108_v38 = vpack.c.bf16 %v582_v36, %v578_v32 }
 0x125   : > { %v504_v39 = vpop.f32.mrf.mxu0  ;;  %v584_v40 = vpop.f32.mrf.mxu1 }
 0x126   : > { %1116 = vst [vmem:[%s1464_s4 + $0x38] sm:$0xff] %v1068_v37   ;;  %1124 = vst [vmem:[%s1464_s4 + $0x78] sm:$0xff] %v1108_v38  }
 0x127   : > { %762 = vst [vmem:[%s1460_s30 + $0x78] sm:$0xff] %v504_v39  ;;  %778 = vst [vmem:[%s1460_s30 + $0xf8] sm:$0xff] %v584_v40 }
 0x128   : > { %1223 = shalt.err (!%p1220_p3)
}
 0x129   : > { %s1224_s29 = scalar_lea.hbm %s1515_s11, 2048  ;;  %s1228_s5 = scalar_lea.hbm %s1595_s2, 4096 }
 0x12a   : > { %p1225_p4 = scmp.ne.s32.totalorder %s1515_s11, %s1224_s29  ;;  %p1229_p9 = scmp.lt.s32.totalorder %s1515_s11, %s1595_s2 }
 0x12b   : > { %p1230_p10 = scmp.lt.s32.totalorder %s1228_s5, %s1224_s29 }
 0x12c   : > { %p1226_p7 = pnand %p1225_p4, %p1367_p5 }
 0x12d   : > { %p1231_p11 = por %p1230_p10, %p1229_p9 }
 0x12e   : > { %p1227_p8 = pneg %p1226_p7 }
 0x130   : > { %p1232_p12 = pnand %p1231_p11, %p1227_p8 }
 0x132   : > { %1235 = shalt.err (!%p1232_p12)
}
 0x133   : > { %s1304_s10 = smov 64   ;;  %s1305_s16 = smov 4  }
 0x134   : > { %1133 = dma.vmem_to_hbm [thread:$0]  (%p1367_p5), %s1517_s6, 2048, %s1515_s11, %s780_s20, %s1304_s10, %s1304_s10, %s1305_s16  }
 0x135   : > { %s785_s17 = scalar_lea.sflag [#allocation5], %s1456_s27  ;;  %s1236_s24 = scalar_lea.vmem %s1524_s8, 4096 }
 0x136   : > { %p1237_p13 = scmp.ne.s32.totalorder %s1524_s8, %s1236_s24  ;;  %s1306_s25 = smov [#allocation4]  }
 0x137   : > { %s1240_s26 = sshll.u32 %s1306_s25, 4  ;;  %s1241_s26 = int_to_ptr.vmem [resolvable:$false] %s1240_s26 }
 0x138   : > { %p1238_p0 = pnand %p1237_p13, %p1367_p5  ;;  %s1242_s28 = scalar_lea.vmem %s1241_s26, 8192 }
 0x139   : > { %p1243_p2 = scmp.lt.s32.totalorder %s1524_s8, %s1241_s26  ;;  %p1244_p3 = scmp.lt.s32.totalorder %s1242_s28, %s1236_s24 }
 0x13a   : > { %p1239_p1 = pneg %p1238_p0 }
 0x13b   : > { %p1245_p4 = por %p1244_p3, %p1243_p2 }
 0x13d   : > { %p1246_p7 = pnand %p1245_p4, %p1239_p1 }
 0x13f   : > { %1249 = shalt.err (!%p1246_p7)
}
 0x140   : > { %s1250_s6 = scalar_lea.hbm %s1522_s19, 4096  ;;  %s1254_s29 = scalar_lea.hbm %s1596_s3, 8192 }
 0x141   : > { %p1251_p8 = scmp.ne.s32.totalorder %s1522_s19, %s1250_s6  ;;  %p1255_p11 = scmp.lt.s32.totalorder %s1522_s19, %s1596_s3 }
 0x142   : > { %p1256_p12 = scmp.lt.s32.totalorder %s1254_s29, %s1250_s6 }
 0x143   : > { %p1252_p9 = pnand %p1251_p8, %p1367_p5 }
 0x144   : > { %p1257_p13 = por %p1256_p12, %p1255_p11 }
 0x145   : > { %p1253_p10 = pneg %p1252_p9 }
 0x147   : > { %p1258_p0 = pnand %p1257_p13, %p1253_p10 }
 0x149   : > { %1261 = shalt.err (!%p1258_p0)
}
 0x14a   : > { %s1307_s5 = smov 128   ;;  %s1308_s7 = smov 8  }
 0x14b   : > { %1134 = dma.vmem_to_hbm [thread:$0]  (%p1367_p5), %s1524_s8, 4096, %s1522_s19, %s785_s17, %s1307_s5, %s1307_s5, %s1308_s7  }
 0x14c PF: > { %p1144_p1 = scmp.ge.s32.totalorder %s1300_s15, 2  ;;  %s829_s9 = sand.u32 1, %s1288_s12  }
 0x14d   : > { %s830_s10 = scalar_lea.sflag [#allocation3], %s829_s9 }
 0x14e   : > { %p1138_p2 = pnand %p1144_p1, %p1371_p6 }
 0x150   : > { %p1139_p3 = pneg %p1138_p2 }
 0x152   : > { %1279 = dma.done.wait (%p1139_p3), %s830_s10, 2048  }
 0x153   : > { %1281 = vsyncadd (%p1139_p3), %s830_s10, 4294965248  ;;  %s839_s16 = scalar_lea.sflag [#allocation5], %s829_s9 }
 0x154   : > { %1283 = dma.done.wait (%p1139_p3), %s839_s16, 4096  }
 0x155   : > { %1285 = vsyncadd (%p1139_p3), %s839_s16, 4294963200  ;;  %p17_p5 = scmp.ge.s32.totalorder %s1354_s18, 4   ;;  %s1599_s12 = smov %s1292_s13 }
 0x156   : > { %s1600_s13 = smov %s1296_s14  ;;  %s1601_s14 = smov %s1365_s21 }
 0x157   : > { %s1602_s15 = smov %s1354_s18  ;;  %19 = sbr.rel (!%p17_p5) target bundleno = 5 (0x5), region = 80 }
 0x15c   :  { %844 = vsyncpa [#allocation3], 1 }
 0x15d   :  { %846 = vsyncpa [#allocation3 + $0x1], 1 }
 0x15e   :  { %847 = vsyncpa [#allocation5], 1 }
 0x15f   :  { %849 = vsyncpa [#allocation5 + $0x1], 1 }

</bundles_post_ra>
